<compile_context>
chip_gen: v7x
topology: tpu7x:2x2x1
jax: 0.10.0
libtpu: 0.0.40
codegen_flags: <defaults>
</compile_context>

<pallas_src>
import functools

import jax
import jax.numpy as jnp
from jax import lax
from jax.experimental import pallas as pl
from jax.experimental.pallas import tpu as pltpu


def _round_up(x, m):
    return ((x + m - 1) // m) * m


def _embed_proj_kernel(wemb_ref, embeds_t_ref, bemb_ref, out_ref):
    # embed_out^T = W_emb @ embeds^T + b_emb  -> (H, L_pad), stored as bf16.
    acc = jnp.dot(wemb_ref[...], embeds_t_ref[...],
                  preferred_element_type=jnp.float32)
    out_ref[...] = (acc + bemb_ref[...]).astype(out_ref.dtype)


def _seq_logits_loss_kernel(emb_ref, wseq_ref, bseq_ref, embed_t_ref, labels_ref,
                            logits_ref, loss_part_ref,
                            *, batch, num_labels, tile_b):
    # fc_seq on this batch tile: (TB, seq_dim) bf16 @ (seq_dim, H) bf16 -> f32
    seq_out = jnp.dot(emb_ref[...], wseq_ref[...],
                      preferred_element_type=jnp.float32) + bseq_ref[...]

    # logits = seq_out @ embed_out^T : standard-layout bf16 matmul, f32 acc.
    logits = jnp.dot(seq_out.astype(jnp.bfloat16), embed_t_ref[...],
                     preferred_element_type=jnp.float32)     # (TB, L_pad)
    logits_ref[...] = logits

    # Stable BCE-with-logits, summed over the *valid* (batch, label) entries.
    tb, lp = logits.shape
    row = pl.program_id(0) * tile_b + lax.broadcasted_iota(jnp.int32, (tb, lp), 0)
    col = lax.broadcasted_iota(jnp.int32, (tb, lp), 1)
    mask = ((row < batch) & (col < num_labels)).astype(jnp.float32)

    z = logits
    y = labels_ref[...]
    loss_elt = jnp.maximum(z, 0.0) - z * y + jnp.log1p(jnp.exp(-jnp.abs(z)))
    partial = jnp.sum(loss_elt * mask)

    # Per-tile partial sum, broadcast into a lane/sublane-dense (1, 8, 128)
    # block (wrapper reads element [i, 0, 0] and finishes the mean).
    loss_part_ref[...] = jnp.full(loss_part_ref.shape, partial, dtype=jnp.float32)


def prot_pubmedbert_forward(embeddings, embeds, w_seq, b_seq, w_emb, b_emb, labels):
    B, seq_dim = embeddings.shape
    L, emb_dim = embeds.shape
    H = w_seq.shape[0]

    # Batch tiling (parallel grid) and lane-dense label padding.
    TB = min(256, _round_up(B, 8))
    B_pad = _round_up(B, TB)
    L_pad = _round_up(L, 128)
    num_tiles = B_pad // TB

    # One-time wrapper-side layout plumbing: transpose/cast weights & label
    # embeddings so every kernel matmul is a standard A @ B in bf16.
    w_seq_t = jnp.asarray(w_seq).T.astype(jnp.bfloat16)            # (seq_dim, H)
    w_emb_b = jnp.asarray(w_emb).astype(jnp.bfloat16)              # (H, emb_dim)
    b_seq2 = jnp.asarray(b_seq).reshape(1, H).astype(jnp.float32)  # (1, H)
    b_emb2 = jnp.asarray(b_emb).reshape(H, 1).astype(jnp.float32)  # (H, 1)

    emb_p = jnp.zeros((B_pad, seq_dim), jnp.bfloat16).at[:B].set(
        embeddings.astype(jnp.bfloat16))
    embeds_t = jnp.zeros((emb_dim, L_pad), jnp.bfloat16).at[:, :L].set(
        embeds.astype(jnp.bfloat16).T)
    labels_p = jnp.zeros((B_pad, L_pad), jnp.float32).at[:B, :L].set(
        labels.astype(jnp.float32))

    # Kernel 1: label-embedding projection, computed exactly once, already
    # transposed to (H, L_pad) for the downstream logits matmul.
    embed_out_t = pl.pallas_call(
        _embed_proj_kernel,
        out_shape=jax.ShapeDtypeStruct((H, L_pad), jnp.bfloat16),
        grid=(1,),
        in_specs=[
            pl.BlockSpec((H, emb_dim), lambda i: (0, 0)),     # W_emb
            pl.BlockSpec((emb_dim, L_pad), lambda i: (0, 0)),  # embeds^T
            pl.BlockSpec((H, 1), lambda i: (0, 0)),            # b_emb
        ],
        out_specs=pl.BlockSpec((H, L_pad), lambda i: (0, 0)),
        cost_estimate=pl.CostEstimate(
            flops=2 * H * emb_dim * L_pad,
            transcendentals=0,
            bytes_accessed=(H * emb_dim + emb_dim * L_pad + H * L_pad) * 2 + H * 4),
    )(w_emb_b, embeds_t, b_emb2)

    # Kernel 2: fc_seq + logits + masked BCE partial sums, tiled over batch.
    kernel = functools.partial(_seq_logits_loss_kernel,
                               batch=B, num_labels=L, tile_b=TB)

    flops = 2 * B_pad * seq_dim * H + 2 * B_pad * H * L_pad
    bytes_accessed = (emb_p.size * 2 + w_seq_t.size * 2 + b_seq2.size * 4
                      + embed_out_t.size * 2 + labels_p.size * 4
                      + B_pad * L_pad * 4 + num_tiles * 8 * 128 * 4)

    logits_pad, loss_part = pl.pallas_call(
        kernel,
        out_shape=(jax.ShapeDtypeStruct((B_pad, L_pad), jnp.float32),
                   jax.ShapeDtypeStruct((num_tiles, 8, 128), jnp.float32)),
        grid=(num_tiles,),
        in_specs=[
            pl.BlockSpec((TB, seq_dim), lambda i: (i, 0)),     # embeddings tile
            pl.BlockSpec((seq_dim, H), lambda i: (0, 0)),      # W_seq^T (resident)
            pl.BlockSpec((1, H), lambda i: (0, 0)),            # b_seq
            pl.BlockSpec((H, L_pad), lambda i: (0, 0)),        # embed_out^T (resident)
            pl.BlockSpec((TB, L_pad), lambda i: (i, 0)),       # labels tile
        ],
        out_specs=(
            pl.BlockSpec((TB, L_pad), lambda i: (i, 0)),       # logits tile
            pl.BlockSpec((1, 8, 128), lambda i: (i, 0, 0)),    # per-tile loss sum
        ),
        compiler_params=pltpu.CompilerParams(
            dimension_semantics=("parallel",),
            vmem_limit_bytes=32 * 1024 * 1024),
        cost_estimate=pl.CostEstimate(
            flops=flops,
            transcendentals=2 * B_pad * L_pad,
            bytes_accessed=bytes_accessed),
    )(emb_p, w_seq_t, b_seq2, embed_out_t, labels_p)

    loss = jnp.sum(loss_part[:, 0, 0]) / (B * L)
    logits = logits_pad[:B, :L]
    return loss, logits


if __name__ == "__main__":
    # Small shapes consistent with the module (seq_dim=1280, hidden=512 in real
    # use; shrunk here but keeping MXU/VPU-friendly multiples).
    B, seq_dim, hidden_dim, emb_dim, num_labels = 8, 256, 128, 128, 16

    key = jax.random.PRNGKey(0)
    k = jax.random.split(key, 7)

    embeddings = jax.random.normal(k[0], (B, seq_dim), dtype=jnp.float32)
    embeds = jax.random.normal(k[1], (num_labels, emb_dim), dtype=jnp.float32)

    # Deterministic synthetic Linear parameters (PyTorch (out, in) layout).
    w_seq = jax.random.normal(k[2], (hidden_dim, seq_dim), dtype=jnp.float32) * 0.02
    b_seq = jax.random.normal(k[3], (hidden_dim,), dtype=jnp.float32) * 0.02
    w_emb = jax.random.normal(k[4], (hidden_dim, emb_dim), dtype=jnp.float32) * 0.02
    b_emb = jax.random.normal(k[5], (hidden_dim,), dtype=jnp.float32) * 0.02

    labels = (jax.random.uniform(k[6], (B, num_labels)) > 0.5).astype(jnp.float32)

    loss, logits = prot_pubmedbert_forward(
        embeddings, embeds, w_seq, b_seq, w_emb, b_emb, labels)
    jax.block_until_ready((loss, logits))

    # Pure-JAX f32 reference (exact module semantics). Kernel uses bf16 matmul
    # inputs with f32 accumulation, so tolerances are loosened accordingly.
    seq_out_ref = embeddings @ w_seq.T + b_seq
    embed_out_ref = embeds @ w_emb.T + b_emb
    logits_ref = seq_out_ref @ embed_out_ref.T
    z, y = logits_ref, labels
    loss_ref = jnp.mean(jnp.maximum(z, 0.0) - z * y + jnp.log1p(jnp.exp(-jnp.abs(z))))

    assert logits.shape == (B, num_labels)
    assert jnp.allclose(logits, logits_ref, atol=5e-2, rtol=5e-2), (
        float(jnp.max(jnp.abs(logits - logits_ref))))
    assert jnp.allclose(loss, loss_ref, atol=5e-2, rtol=5e-2), (
        float(loss), float(loss_ref))

    print("KERNEL_OK")
</pallas_src>

<mosaic_0001>
module attributes {stable_mosaic.version = 11 : i64} {
  func.func @_embed_proj_kernel(%arg0: i32, %arg1: memref<128x128xbf16, #tpu.memory_space<vmem>>, %arg2: memref<128x128xbf16, #tpu.memory_space<vmem>>, %arg3: memref<128x1xf32, #tpu.memory_space<vmem>>, %arg4: memref<128x128xbf16, #tpu.memory_space<vmem>>) attributes {dimension_semantics = [#tpu.dimension_semantics<arbitrary>], iteration_bounds = array<i64: 1>, scalar_prefetch = 0 : i64, scratch_operands = 0 : i64, tpu.core_type = #tpu.core_type<tc>, window_params = [{pipeline_mode = #tpu.pipeline_mode<synchronous>, transform_indices = @transform_0, window_bounds = array<i64: 128, 128>}, {pipeline_mode = #tpu.pipeline_mode<synchronous>, transform_indices = @transform_1, window_bounds = array<i64: 128, 128>}, {pipeline_mode = #tpu.pipeline_mode<synchronous>, transform_indices = @transform_2, window_bounds = array<i64: 128, 1>}, {pipeline_mode = #tpu.pipeline_mode<synchronous>, transform_indices = @transform_3, window_bounds = array<i64: 128, 128>}]} {
    %c0 = arith.constant 0 : index
    %c0_0 = arith.constant 0 : index
    %0 = vector.load %arg1[%c0, %c0_0] : memref<128x128xbf16, #tpu.memory_space<vmem>>, vector<128x128xbf16>
    %c0_1 = arith.constant 0 : index
    %c0_2 = arith.constant 0 : index
    %1 = vector.load %arg2[%c0_1, %c0_2] : memref<128x128xbf16, #tpu.memory_space<vmem>>, vector<128x128xbf16>
    %cst = arith.constant dense<0.000000e+00> : vector<128x128xf32>
    %2 = tpu.matmul %0, %1, %cst {dimension_numbers = #tpu.dot_dimension_numbers<[1], [0], [0], [1], [0, 0, 1, 1], [], []>} : vector<128x128xbf16>, vector<128x128xbf16>, vector<128x128xf32> -> vector<128x128xf32>
    %c0_3 = arith.constant 0 : index
    %c0_4 = arith.constant 0 : index
    %3 = vector.load %arg3[%c0_3, %c0_4] : memref<128x1xf32, #tpu.memory_space<vmem>>, vector<128x1xf32>
    %4 = vector.broadcast %3 : vector<128x1xf32> to vector<128x128xf32>
    %5 = arith.addf %2, %4 : vector<128x128xf32>
    %6 = arith.truncf %5 : vector<128x128xf32> to vector<128x128xbf16>
    %c0_5 = arith.constant 0 : index
    %c0_6 = arith.constant 0 : index
    %7 = vector.load %arg4[%c0_5, %c0_6] : memref<128x128xbf16, #tpu.memory_space<vmem>>, vector<128x128xbf16>
    tpu.vector_store %arg4[%c0_5, %c0_6], %6 {strides = array<i32>} : memref<128x128xbf16, #tpu.memory_space<vmem>>, vector<128x128xbf16>,
    return
  }
  func.func @transform_0(%arg0: i32) -> (i32, i32) {
    %c0_i32 = arith.constant 0 : i32
    %c0_i32_0 = arith.constant 0 : i32
    %c0_i32_1 = arith.constant 0 : i32
    return %c0_i32, %c0_i32_0 : i32, i32
  }
  func.func @transform_1(%arg0: i32) -> (i32, i32) {
    %c0_i32 = arith.constant 0 : i32
    %c0_i32_0 = arith.constant 0 : i32
    %c0_i32_1 = arith.constant 0 : i32
    return %c0_i32, %c0_i32_0 : i32, i32
  }
  func.func @transform_2(%arg0: i32) -> (i32, i32) {
    %c0_i32 = arith.constant 0 : i32
    %c0_i32_0 = arith.constant 0 : i32
    %c0_i32_1 = arith.constant 0 : i32
    return %c0_i32, %c0_i32_0 : i32, i32
  }
  func.func @transform_3(%arg0: i32) -> (i32, i32) {
    %c0_i32 = arith.constant 0 : i32
    %c0_i32_0 = arith.constant 0 : i32
    %c0_i32_1 = arith.constant 0 : i32
    return %c0_i32, %c0_i32_0 : i32, i32
  }
}

</mosaic_0001>

<bundles_post_ra>
// kernel: tpu_custom_call.1
= control target key start
LH: loop header
LB: loop body
LE: loop exit
PB: predicated region body
PF: predicated region fallthrough
CT: control target
= control target key end

     0   :  { %v638_v2 = vmov 0   ;;  %s770_s0 = inlined_call_operand.vmem [shape: bf16[128,128], index: 0, kind: input, shape index: {}]   ;;  %s771_s1 = inlined_call_operand.vmem [shape: bf16[128,128], index: 1, kind: input, shape index: {}]   ;;  %s772_s2 = inlined_call_operand.vmem [shape: f32[128,1], index: 2, kind: input, shape index: {}]   ;;  %s773_s3 = inlined_call_operand.hbm [shape: bf16[128,128], index: 3, kind: output, shape index: {}]  }
   0x1   :  { %v598_v0 = vld [vmem:[%s771_s1] sm:$0xff]   ;;  %v599_v1 = vld [vmem:[%s771_s1 + $0x8] sm:$0xff]   ;;  %597 = vset.pattern.permute.xlu1 %v638_v2  ;;  %596 = vset.pattern.permute.xlu0 %v638_v2  ;;  %v600_v3 = vld [vmem:[%s771_s1 + $0x10] sm:$0xff]  }
   0x2   :  { %544 = vmatprep.subr.bf16.mxu0 %v598_v0  ;;  %576 = vmatprep.subr.bf16.mxu1 %v598_v0  ;;  %v601_v4 = vld [vmem:[%s771_s1 + $0x18] sm:$0xff]   ;;  %v606_v5 = vld [vmem:[%s770_s0] sm:$0xff]   ;;  %v603_v8 = vld [vmem:[%s771_s1 + $0x28] sm:$0xff]  }
   0x3   :  { %545 = vmatpush3.bf16.msra.mxu0 %v598_v0  ;;  %584 = vmatpush3.bf16.msra.mxu1 %v598_v0  ;;  %v607_v6 = vld [vmem:[%s770_s0 + $0x20] sm:$0xff]   ;;  %v50_v9 = vld [vmem:[%s772_s2 + $0x10] sm:$0xff]  ;;  %v51_v11 = vld [vmem:[%s772_s2 + $0x18] sm:$0xff] }
   0x4   :  { %546 = vmatprep.subr.bf16.mxu0 %v599_v1  ;;  %577 = vmatprep.subr.bf16.mxu1 %v599_v1  ;;  %v602_v7 = vld [vmem:[%s771_s1 + $0x20] sm:$0xff]   ;;  %v49_v12 = vld [vmem:[%s772_s2 + $0x8] sm:$0xff]  ;;  %v604_v13 = vld [vmem:[%s771_s1 + $0x30] sm:$0xff]  }
   0x5   :  { %560 = vmatprep.mubr.bf16.mxu0 %v606_v5  ;;  %568 = vmatprep.mubr.bf16.mxu1 %v607_v6  ;;  %v48_v10 = vld [vmem:[%s772_s2] sm:$0xff] }
   0x6   :  { %76 = vperm.xlu1 %597, %v50_v9   ;;  %66 = vperm.xlu0 %596, %v48_v10  }
   0x7   :  { %547 = vmatpush3.bf16.msra.mxu0 %v599_v1  ;;  %585 = vmatpush3.bf16.msra.mxu1 %v599_v1 }
   0x8   :  { %548 = vmatprep.subr.bf16.mxu0 %v600_v3  ;;  %578 = vmatprep.subr.bf16.mxu1 %v600_v3 }
   0xa   :  { %81 = vperm.xlu1 %597, %v51_v11   ;;  %71 = vperm.xlu0 %596, %v49_v12  }
   0xb   :  { %549 = vmatpush3.bf16.msra.mxu0 %v600_v3  ;;  %586 = vmatpush3.bf16.msra.mxu1 %v600_v3 }
   0xc   :  { %550 = vmatprep.subr.bf16.mxu0 %v601_v4  ;;  %579 = vmatprep.subr.bf16.mxu1 %v601_v4 }
   0xf   :  { %551 = vmatpush3.bf16.msra.mxu0 %v601_v4  ;;  %587 = vmatpush3.bf16.msra.mxu1 %v601_v4 }
  0x10   :  { %552 = vmatprep.subr.bf16.mxu0 %v602_v7  ;;  %580 = vmatprep.subr.bf16.mxu1 %v602_v7 }
  0x13   :  { %553 = vmatpush3.bf16.msra.mxu0 %v602_v7  ;;  %588 = vmatpush3.bf16.msra.mxu1 %v602_v7 }
  0x14   :  { %554 = vmatprep.subr.bf16.mxu0 %v603_v8  ;;  %581 = vmatprep.subr.bf16.mxu1 %v603_v8 }
  0x15   :  { %8 = vsyncpa [#allocation3], 0  ;;  %v53_v14 = vld [vmem:[%s772_s2 + $0x28] sm:$0xff]  ;;  %v52_v15 = vld [vmem:[%s772_s2 + $0x20] sm:$0xff] }
  0x16   :  { %v605_v16 = vld [vmem:[%s771_s1 + $0x38] sm:$0xff]   ;;  %91 = vperm.xlu1 %597, %v53_v14   ;;  %86 = vperm.xlu0 %596, %v52_v15   ;;  %v54_v18 = vld [vmem:[%s772_s2 + $0x30] sm:$0xff]  ;;  %v608_v19 = vld [vmem:[%s770_s0 + $0x8] sm:$0xff]  }
  0x17   :  { %555 = vmatpush3.bf16.msra.mxu0 %v603_v8  ;;  %589 = vmatpush3.bf16.msra.mxu1 %v603_v8  ;;  %v55_v17 = vld [vmem:[%s772_s2 + $0x38] sm:$0xff]  ;;  %v609_v20 = vld [vmem:[%s770_s0 + $0x28] sm:$0xff]   ;;  %v56_v22 = vld [vmem:[%s772_s2 + $0x40] sm:$0xff] }
  0x18   :  { %556 = vmatprep.subr.bf16.mxu0 %v604_v13  ;;  %582 = vmatprep.subr.bf16.mxu1 %v604_v13  ;;  %v57_v21 = vld [vmem:[%s772_s2 + $0x48] sm:$0xff]  ;;  %v610_v23 = vld [vmem:[%s770_s0 + $0x10] sm:$0xff]   ;;  %v59_v25 = vld [vmem:[%s772_s2 + $0x58] sm:$0xff] }
  0x19   :  { %v611_v24 = vld [vmem:[%s770_s0 + $0x30] sm:$0xff]   ;;  %v612_v27 = vld [vmem:[%s770_s0 + $0x18] sm:$0xff]   ;;  %v61_v29 = vld [vmem:[%s772_s2 + $0x68] sm:$0xff] }
  0x1a   :  { %101 = vperm.xlu1 %597, %v55_v17   ;;  %96 = vperm.xlu0 %596, %v54_v18   ;;  %v58_v26 = vld [vmem:[%s772_s2 + $0x50] sm:$0xff]  ;;  %v613_v28 = vld [vmem:[%s770_s0 + $0x38] sm:$0xff]   ;;  %v60_v30 = vld [vmem:[%s772_s2 + $0x60] sm:$0xff]  ;;  %s639_s0 = smov [#allocation2]  }
  0x1b   :  { %557 = vmatpush3.bf16.msra.mxu0 %v604_v13  ;;  %590 = vmatpush3.bf16.msra.mxu1 %v604_v13  ;;  %v63_v31 = vld [vmem:[%s772_s2 + $0x78] sm:$0xff]  ;;  %v62_v32 = vld [vmem:[%s772_s2 + $0x70] sm:$0xff]  ;;  %s422_s2 = sshll.u32 %s639_s0, 4  ;;  %s423_s2 = int_to_ptr.vmem [resolvable:$true] %s422_s2 }
  0x1c   :  { %558 = vmatprep.subr.bf16.mxu0 %v605_v16  ;;  %583 = vmatprep.subr.bf16.mxu1 %v605_v16  ;;  %s614_s21 = scalar_lea.vmem %s423_s2, 1024  ;;  %p619_p1 = scmp.lt.s32.totalorder %s423_s2, %s423_s2 }
  0x1d   :  { %p615_p0 = scmp.ne.s32.totalorder %s423_s2, %s614_s21  ;;  %p620_p2 = scmp.lt.s32.totalorder %s614_s21, %s614_s21 }
  0x1e   :  { %111 = vperm.xlu1 %597, %v57_v21   ;;  %106 = vperm.xlu0 %596, %v56_v22  }
  0x1f   :  { %559 = vmatpush3.bf16.msra.mxu0 %v605_v16  ;;  %591 = vmatpush3.bf16.msra.mxu1 %v605_v16  ;;  %p621_p3 = por %p620_p2, %p619_p1 }
  0x21   :  { %p622_p4 = pnand %p621_p3, %p615_p0 }
  0x22   :  { %561 = vmatmul.mubr.bf16.vlgmr.msra.gmra.mrb[0].mxu0 %v608_v19  ;;  %569 = vmatmul.mubr.bf16.vlgmr.msra.gmra.mrb[0].mxu1 %v609_v20 }
  0x23   :  { %564 = vmatprep.mubr.bf16.mxu0 %v610_v23  ;;  %572 = vmatprep.mubr.bf16.mxu1 %v611_v24 }
  0x24   :  { %121 = vperm.xlu1 %597, %v59_v25   ;;  %116 = vperm.xlu0 %596, %v58_v26  }
  0x28   :  { %131 = vperm.xlu1 %597, %v61_v29   ;;  %126 = vperm.xlu0 %596, %v60_v30  }
  0x2a   :  { %565 = vmatmul.mubr.bf16.gmra.mrb[4].mxu0 %v612_v27  ;;  %573 = vmatmul.mubr.bf16.gmra.mrb[4].mxu1 %v613_v28 }
  0x2c   :  { %141 = vperm.xlu1 %597, %v63_v31   ;;  %136 = vperm.xlu0 %596, %v62_v32  }
  0x85   :  { %v77_v33 = vpop.permute.xlu1 %76  ;;  %v67_v34 = vpop.permute.xlu0 %66 }
  0x89   :  { %v82_v35 = vpop.permute.xlu1 %81  ;;  %v72_v36 = vpop.permute.xlu0 %71 }
  0x95   :  { %v92_v37 = vpop.permute.xlu1 %91  ;;  %v87_v38 = vpop.permute.xlu0 %86 }
  0x99   :  { %v102_v39 = vpop.permute.xlu1 %101  ;;  %v97_v40 = vpop.permute.xlu0 %96 }
  0x9d   :  { %v112_v41 = vpop.permute.xlu1 %111  ;;  %v107_v42 = vpop.permute.xlu0 %106 }
  0xa3   :  { %v122_v43 = vpop.permute.xlu1 %121  ;;  %v117_v44 = vpop.permute.xlu0 %116 }
  0xa7   :  { %v132_v45 = vpop.permute.xlu1 %131  ;;  %v127_v46 = vpop.permute.xlu0 %126 }
  0xab   :  { %v142_v3 = vpop.permute.xlu1 %141  ;;  %v137_v4 = vpop.permute.xlu0 %136 }
  0xf5   :  { %v562_v47 = vpop.f32.mrb[0].mxu0  ;;  %v570_v48 = vpop.f32.mrb[0].mxu1 }
  0xf6   :  { %v274_v49 = vpop.f32.mrb[1].mxu0  ;;  %v306_v50 = vpop.f32.mrb[1].mxu1  ;;  %v283_v53 = vadd.f32 %v562_v47, %v77_v33  ;;  %v315_v54 = vadd.f32 %v570_v48, %v117_v44 }
  0xf7   :  { %v563_v51 = vpop.f32.mrb[2].mxu0  ;;  %v571_v52 = vpop.f32.mrb[2].mxu1  ;;  %v275_v59 = vadd.f32 %v274_v49, %v67_v34  ;;  %v307_v60 = vadd.f32 %v306_v50, %v107_v42 }
  0xf8   :  { %v286_v55 = vadd.f32 %v563_v51, %v82_v35  ;;  %v318_v56 = vadd.f32 %v571_v52, %v122_v43  ;;  %v277_v57 = vpop.f32.mrb[3].mxu0  ;;  %v309_v58 = vpop.f32.mrb[3].mxu1 }
  0xf9   :  { %v278_v61 = vadd.f32 %v277_v57, %v72_v36  ;;  %v310_v62 = vadd.f32 %v309_v58, %v112_v41 }
  0xfa   :  { %v489_v63 = vpack.c.bf16 %v286_v55, %v283_v53  ;;  %v509_v0 = vpack.c.bf16 %v318_v56, %v315_v54 }
  0xfb   :  { %v484_v1 = vpack.c.bf16 %v278_v61, %v275_v59  ;;  %v504_v2 = vpack.c.bf16 %v310_v62, %v307_v60 }
  0xfc   :  { %521 = vst [vmem:[#allocation2 + $0x8] sm:$0xff] %v489_v63   ;;  %525 = vst [vmem:[#allocation2 + $0x28] sm:$0xff] %v509_v0  }
  0xfd   :  { %485 = vst [vmem:[#allocation2] sm:$0xff] %v484_v1   ;;  %524 = vst [vmem:[#allocation2 + $0x20] sm:$0xff] %v504_v2   ;;  %v566_v5 = vpop.f32.mrb[4].mxu0  ;;  %v574_v6 = vpop.f32.mrb[4].mxu1 }
  0xfe   :  { %v290_v7 = vpop.f32.mrb[5].mxu0  ;;  %v322_v8 = vpop.f32.mrb[5].mxu1  ;;  %v299_v11 = vadd.f32 %v566_v5, %v97_v40  ;;  %v331_v12 = vadd.f32 %v574_v6, %v137_v4 }
  0xff   :  { %v567_v9 = vpop.f32.mrb[6].mxu0  ;;  %v575_v10 = vpop.f32.mrb[6].mxu1  ;;  %v291_v17 = vadd.f32 %v290_v7, %v87_v38  ;;  %v323_v18 = vadd.f32 %v322_v8, %v127_v46 }
 0x100   :  { %v302_v13 = vadd.f32 %v567_v9, %v102_v39  ;;  %v334_v14 = vadd.f32 %v575_v10, %v142_v3  ;;  %v293_v15 = vpop.f32.mrb[7].mxu0  ;;  %v325_v16 = vpop.f32.mrb[7].mxu1 }
 0x101   :  { %v294_v19 = vadd.f32 %v293_v15, %v92_v37  ;;  %v326_v20 = vadd.f32 %v325_v16, %v132_v45 }
 0x102   :  { %v499_v21 = vpack.c.bf16 %v302_v13, %v299_v11  ;;  %v519_v22 = vpack.c.bf16 %v334_v14, %v331_v12 }
 0x103   :  { %v494_v23 = vpack.c.bf16 %v294_v19, %v291_v17  ;;  %v514_v24 = vpack.c.bf16 %v326_v20, %v323_v18 }
 0x104   :  { %523 = vst [vmem:[#allocation2 + $0x18] sm:$0xff] %v499_v21   ;;  %527 = vst [vmem:[#allocation2 + $0x38] sm:$0xff] %v519_v22  }
 0x105   :  { %522 = vst [vmem:[#allocation2 + $0x10] sm:$0xff] %v494_v23   ;;  %526 = vst [vmem:[#allocation2 + $0x30] sm:$0xff] %v514_v24  }
 0x106   :  { %625 = shalt.err (!%p622_p4)
}
 0x107   :  { %s626_s23 = scalar_lea.hbm %s773_s3, 1024 }
 0x108   :  { %p627_p5 = scmp.ne.s32.totalorder %s773_s3, %s626_s23  ;;  %p630_p6 = scmp.lt.u32.totalorder %s626_s23, %s773_s3 }
 0x10a   :  { %p632_p7 = pnand %p630_p6, %p627_p5 }
 0x10c   :  { %635 = shalt.err (!%p632_p7)
}
 0x10d   :  { %s640_s28 = smov 64   ;;  %s641_s29 = smov 4  }
 0x10e   :  { %428 = dma.vmem_to_hbm [thread:$0]  %s423_s2, 1024, %s773_s3, [#allocation3], %s640_s28, %s640_s28, %s641_s29  }
 0x10f   :  { %636 = dma.done.wait [#allocation3], 1024  }
 0x110   :  { %637 = vsyncadd [#allocation3], 4294966272 }
 0x111   :  { %432 = vsyncpa [#allocation3], 1 }

</bundles_post_ra>
